<compile_context>
chip_gen: v5e
topology: v5e:2x2
jax: 0.10.0
libtpu: 0.0.40
codegen_flags: <defaults>
</compile_context>

<pallas_src>
import math

import jax
import jax.numpy as jnp
from jax.experimental import pallas as pl
from jax.experimental.pallas import tpu as pltpu


def _pointwise_linear_relu_kernel(w_ref, b_ref, x_ref, s_ref):
    """s[o, :] = relu(sum_c w[o, c] * x[c, :] + b[o]) for one (batch, pixel-tile)."""
    # w_ref: (O, C) f32 in SMEM; b_ref: (O,) f32 in SMEM (scalar reads)
    # x_ref: (C, T) f32 VMEM tile (pixels on the lane axis)
    # s_ref: (O, T) f32 VMEM tile
    C = x_ref.shape[0]
    O = s_ref.shape[0]
    x = x_ref[...]                                   # (C, T), strip-mined by Mosaic
    for o in range(O):                               # tiny static loop -> unrolled VPU FMAs
        acc = x[0:1, :] * w_ref[o, 0]
        for c in range(1, C):
            acc = acc + x[c:c + 1, :] * w_ref[o, c]
        # direct per-row store: one live accumulator, no concat / extra copy
        s_ref[o:o + 1, :] = jnp.maximum(acc + b_ref[o], 0.0).astype(s_ref.dtype)


def _choose_pixel_tile(hw, batch, cap=32768, min_tile=1024):
    """Pick a pixel-tile size T that divides HW exactly (no pad, no tail slice)."""
    if hw % 128 != 0 or hw <= min_tile:
        # Full-extent block along the last dim is always legal (even if <128-
        # aligned); covers small images and odd spatial sizes.
        # TODO(synk): very large non-128-aligned HW would need a masked-tail
        # variant; not needed for the shipped sizes.
        return hw
    # hw is a multiple of 128: pick a multiple-of-128 divisor of hw.
    m = hw // 128
    divisors = [128 * k for k in range(1, m + 1) if m % k == 0 and 128 * k <= cap]
    t = max(divisors)
    # Keep enough grid steps for v7x's 2 TensorCores / pipeline double-buffering.
    if batch * (hw // t) < 8:
        better = [d for d in divisors if d >= min_tile and batch * (hw // d) >= 8]
        if better:
            t = max(better)
    return t


def initializer_forward(x, h0, w, b):
    """x: (B, C, H, W) f32; h0: (C, S, kh, kw) f32; w: (O, C) f32; b: (O,) f32."""
    B, C, H, W = x.shape
    O = w.shape[0]
    HW = H * W

    # Free reshape: pixels on the lane axis.
    x3 = x.reshape(B, C, HW)
    T = _choose_pixel_tile(HW, B)
    grid = (B, HW // T)

    s3 = pl.pallas_call(
        _pointwise_linear_relu_kernel,
        out_shape=jax.ShapeDtypeStruct((B, O, HW), jnp.float32),
        grid=grid,
        in_specs=[
            pl.BlockSpec(memory_space=pltpu.MemorySpace.SMEM),      # w (O, C) scalars
            pl.BlockSpec(memory_space=pltpu.MemorySpace.SMEM),      # b (O,)   scalars
            pl.BlockSpec((None, C, T), lambda bi, j: (bi, 0, j)),   # x tile (C, T)
        ],
        out_specs=pl.BlockSpec((None, O, T), lambda bi, j: (bi, 0, j)),
        compiler_params=pltpu.CompilerParams(
            dimension_semantics=("parallel", "parallel"),
        ),
    )(w, b, x3)

    s = s3.reshape(B, O, H, W)

    # relu(h0) is 108 elements: plain JAX (fused by XLA), then a free broadcast
    # over batch -- no dedicated kernel launch / HBM round trip.
    h = jnp.broadcast_to(jnp.maximum(h0, 0.0)[None], (B,) + h0.shape)
    return s, h


def make_params(key, channels, source_channels, kernel_size, groups):
    """Deterministic parameter init mimicking the PyTorch module's __init__."""
    k_h0, k_w, k_b = jax.random.split(key, 3)

    # h0: kaiming_uniform_(a=sqrt(5)) -> bound = 1/sqrt(fan_in)
    fan_in_h0 = source_channels * math.prod(kernel_size)
    bound_h0 = 1.0 / math.sqrt(fan_in_h0)
    h0 = jax.random.uniform(
        k_h0, (channels, source_channels, *kernel_size),
        minval=-bound_h0, maxval=bound_h0, dtype=jnp.float32)

    # Linear(channels -> groups*source_channels): PyTorch default init
    out_ch = groups * source_channels
    bound_w = 1.0 / math.sqrt(channels)
    w = jax.random.uniform(k_w, (out_ch, channels),
                           minval=-bound_w, maxval=bound_w, dtype=jnp.float32)
    b = jax.random.uniform(k_b, (out_ch,),
                           minval=-bound_w, maxval=bound_w, dtype=jnp.float32)
    return h0, w, b


if __name__ == "__main__":
    channels = 4
    source_channels = 3
    kernel_size = (3, 3)
    groups = 2
    batch, H, W = 2, 16, 16

    key = jax.random.PRNGKey(0)
    k_params, k_x = jax.random.split(key)
    h0, w, b = make_params(k_params, channels, source_channels, kernel_size, groups)
    x = jax.random.normal(k_x, (batch, channels, H, W), dtype=jnp.float32)

    s, h = initializer_forward(x, h0, w, b)
    s, h = jax.block_until_ready((s, h))

    # sanity checks against plain-JAX reference
    s_ref = jnp.maximum(
        jnp.einsum("bchw,oc->bohw", x, w) + b[None, :, None, None], 0.0)
    h_ref = jnp.broadcast_to(jnp.maximum(h0, 0.0)[None], (batch,) + h0.shape)
    assert s.shape == (batch, groups * source_channels, H, W)
    assert h.shape == (batch, channels, source_channels, *kernel_size)
    assert jnp.allclose(s, s_ref, atol=1e-5)
    assert jnp.allclose(h, h_ref, atol=1e-6)

    print("KERNEL_OK")
</pallas_src>

<mosaic_0001>
module attributes {stable_mosaic.version = 11 : i64} {
  func.func @_pointwise_linear_relu_kernel(%arg0: i32, %arg1: i32, %arg2: memref<6x4xf32, #tpu.memory_space<smem>>, %arg3: memref<6xf32, #tpu.memory_space<smem>>, %arg4: memref<1x4x256xf32, #tpu.memory_space<vmem>>, %arg5: memref<1x6x256xf32, #tpu.memory_space<vmem>>) attributes {dimension_semantics = [#tpu.dimension_semantics<parallel>, #tpu.dimension_semantics<parallel>], iteration_bounds = array<i64: 2, 1>, scalar_prefetch = 0 : i64, scratch_operands = 0 : i64, tpu.core_type = #tpu.core_type<tc>, window_params = [{transform_indices = @transform_0, window_bounds = array<i64: 6, 4>}, {transform_indices = @transform_1, window_bounds = array<i64: 6>}, {transform_indices = @transform_2, window_bounds = array<i64: 1, 4, 256>}, {transform_indices = @transform_3, window_bounds = array<i64: 1, 6, 256>}]} {
    %c0 = arith.constant 0 : index
    %c0_0 = arith.constant 0 : index
    %c0_1 = arith.constant 0 : index
    %0 = vector.load %arg4[%c0, %c0_0, %c0_1] : memref<1x4x256xf32, #tpu.memory_space<vmem>>, vector<1x4x256xf32>
    %1 = vector.shape_cast %0 : vector<1x4x256xf32> to vector<4x256xf32>
    %2 = vector.extract_strided_slice %1 {offsets = [0, 0], sizes = [1, 256], strides = [1, 1]} : vector<4x256xf32> to vector<1x256xf32>
    %c0_2 = arith.constant 0 : index
    %c0_3 = arith.constant 0 : index
    %3 = memref.load %arg2[%c0_2, %c0_3] : memref<6x4xf32, #tpu.memory_space<smem>>
    %4 = vector.broadcast %3 : f32 to vector<1x256xf32>
    %5 = arith.mulf %2, %4 : vector<1x256xf32>
    %6 = vector.extract_strided_slice %1 {offsets = [1, 0], sizes = [1, 256], strides = [1, 1]} : vector<4x256xf32> to vector<1x256xf32>
    %c0_4 = arith.constant 0 : index
    %c1 = arith.constant 1 : index
    %7 = memref.load %arg2[%c0_4, %c1] : memref<6x4xf32, #tpu.memory_space<smem>>
    %8 = vector.broadcast %7 : f32 to vector<1x256xf32>
    %9 = arith.mulf %6, %8 : vector<1x256xf32>
    %10 = arith.addf %5, %9 : vector<1x256xf32>
    %11 = vector.extract_strided_slice %1 {offsets = [2, 0], sizes = [1, 256], strides = [1, 1]} : vector<4x256xf32> to vector<1x256xf32>
    %c0_5 = arith.constant 0 : index
    %c2 = arith.constant 2 : index
    %12 = memref.load %arg2[%c0_5, %c2] : memref<6x4xf32, #tpu.memory_space<smem>>
    %13 = vector.broadcast %12 : f32 to vector<1x256xf32>
    %14 = arith.mulf %11, %13 : vector<1x256xf32>
    %15 = arith.addf %10, %14 : vector<1x256xf32>
    %16 = vector.extract_strided_slice %1 {offsets = [3, 0], sizes = [1, 256], strides = [1, 1]} : vector<4x256xf32> to vector<1x256xf32>
    %c0_6 = arith.constant 0 : index
    %c3 = arith.constant 3 : index
    %17 = memref.load %arg2[%c0_6, %c3] : memref<6x4xf32, #tpu.memory_space<smem>>
    %18 = vector.broadcast %17 : f32 to vector<1x256xf32>
    %19 = arith.mulf %16, %18 : vector<1x256xf32>
    %20 = arith.addf %15, %19 : vector<1x256xf32>
    %c0_7 = arith.constant 0 : index
    %21 = memref.load %arg3[%c0_7] : memref<6xf32, #tpu.memory_space<smem>>
    %22 = vector.broadcast %21 : f32 to vector<1x256xf32>
    %23 = arith.addf %20, %22 : vector<1x256xf32>
    %cst = arith.constant 0.000000e+00 : f32
    %24 = vector.broadcast %cst : f32 to vector<1x256xf32>
    %25 = arith.maximumf %23, %24 : vector<1x256xf32>
    %c0_8 = arith.constant 0 : index
    %c0_9 = arith.constant 0 : index
    %c0_10 = arith.constant 0 : index
    %26 = vector.load %arg5[%c0_8, %c0_9, %c0_10] : memref<1x6x256xf32, #tpu.memory_space<vmem>>, vector<1x1x256xf32>
    %27 = vector.shape_cast %26 : vector<1x1x256xf32> to vector<1x256xf32>
    %28 = vector.shape_cast %25 : vector<1x256xf32> to vector<1x1x256xf32>
    tpu.vector_store %arg5[%c0_8, %c0_9, %c0_10], %28 {strides = array<i32>} : memref<1x6x256xf32, #tpu.memory_space<vmem>>, vector<1x1x256xf32>,
    %29 = vector.extract_strided_slice %1 {offsets = [0, 0], sizes = [1, 256], strides = [1, 1]} : vector<4x256xf32> to vector<1x256xf32>
    %c1_11 = arith.constant 1 : index
    %c0_12 = arith.constant 0 : index
    %30 = memref.load %arg2[%c1_11, %c0_12] : memref<6x4xf32, #tpu.memory_space<smem>>
    %31 = vector.broadcast %30 : f32 to vector<1x256xf32>
    %32 = arith.mulf %29, %31 : vector<1x256xf32>
    %33 = vector.extract_strided_slice %1 {offsets = [1, 0], sizes = [1, 256], strides = [1, 1]} : vector<4x256xf32> to vector<1x256xf32>
    %c1_13 = arith.constant 1 : index
    %c1_14 = arith.constant 1 : index
    %34 = memref.load %arg2[%c1_13, %c1_14] : memref<6x4xf32, #tpu.memory_space<smem>>
    %35 = vector.broadcast %34 : f32 to vector<1x256xf32>
    %36 = arith.mulf %33, %35 : vector<1x256xf32>
    %37 = arith.addf %32, %36 : vector<1x256xf32>
    %38 = vector.extract_strided_slice %1 {offsets = [2, 0], sizes = [1, 256], strides = [1, 1]} : vector<4x256xf32> to vector<1x256xf32>
    %c1_15 = arith.constant 1 : index
    %c2_16 = arith.constant 2 : index
    %39 = memref.load %arg2[%c1_15, %c2_16] : memref<6x4xf32, #tpu.memory_space<smem>>
    %40 = vector.broadcast %39 : f32 to vector<1x256xf32>
    %41 = arith.mulf %38, %40 : vector<1x256xf32>
    %42 = arith.addf %37, %41 : vector<1x256xf32>
    %43 = vector.extract_strided_slice %1 {offsets = [3, 0], sizes = [1, 256], strides = [1, 1]} : vector<4x256xf32> to vector<1x256xf32>
    %c1_17 = arith.constant 1 : index
    %c3_18 = arith.constant 3 : index
    %44 = memref.load %arg2[%c1_17, %c3_18] : memref<6x4xf32, #tpu.memory_space<smem>>
    %45 = vector.broadcast %44 : f32 to vector<1x256xf32>
    %46 = arith.mulf %43, %45 : vector<1x256xf32>
    %47 = arith.addf %42, %46 : vector<1x256xf32>
    %c1_19 = arith.constant 1 : index
    %48 = memref.load %arg3[%c1_19] : memref<6xf32, #tpu.memory_space<smem>>
    %49 = vector.broadcast %48 : f32 to vector<1x256xf32>
    %50 = arith.addf %47, %49 : vector<1x256xf32>
    %cst_20 = arith.constant 0.000000e+00 : f32
    %51 = vector.broadcast %cst_20 : f32 to vector<1x256xf32>
    %52 = arith.maximumf %50, %51 : vector<1x256xf32>
    %c0_21 = arith.constant 0 : index
    %c1_22 = arith.constant 1 : index
    %c0_23 = arith.constant 0 : index
    %53 = vector.load %arg5[%c0_21, %c1_22, %c0_23] : memref<1x6x256xf32, #tpu.memory_space<vmem>>, vector<1x1x256xf32>
    %54 = vector.shape_cast %53 : vector<1x1x256xf32> to vector<1x256xf32>
    %55 = vector.shape_cast %52 : vector<1x256xf32> to vector<1x1x256xf32>
    tpu.vector_store %arg5[%c0_21, %c1_22, %c0_23], %55 {strides = array<i32>} : memref<1x6x256xf32, #tpu.memory_space<vmem>>, vector<1x1x256xf32>,
    %56 = vector.extract_strided_slice %1 {offsets = [0, 0], sizes = [1, 256], strides = [1, 1]} : vector<4x256xf32> to vector<1x256xf32>
    %c2_24 = arith.constant 2 : index
    %c0_25 = arith.constant 0 : index
    %57 = memref.load %arg2[%c2_24, %c0_25] : memref<6x4xf32, #tpu.memory_space<smem>>
    %58 = vector.broadcast %57 : f32 to vector<1x256xf32>
    %59 = arith.mulf %56, %58 : vector<1x256xf32>
    %60 = vector.extract_strided_slice %1 {offsets = [1, 0], sizes = [1, 256], strides = [1, 1]} : vector<4x256xf32> to vector<1x256xf32>
    %c2_26 = arith.constant 2 : index
    %c1_27 = arith.constant 1 : index
    %61 = memref.load %arg2[%c2_26, %c1_27] : memref<6x4xf32, #tpu.memory_space<smem>>
    %62 = vector.broadcast %61 : f32 to vector<1x256xf32>
    %63 = arith.mulf %60, %62 : vector<1x256xf32>
    %64 = arith.addf %59, %63 : vector<1x256xf32>
    %65 = vector.extract_strided_slice %1 {offsets = [2, 0], sizes = [1, 256], strides = [1, 1]} : vector<4x256xf32> to vector<1x256xf32>
    %c2_28 = arith.constant 2 : index
    %c2_29 = arith.constant 2 : index
    %66 = memref.load %arg2[%c2_28, %c2_29] : memref<6x4xf32, #tpu.memory_space<smem>>
    %67 = vector.broadcast %66 : f32 to vector<1x256xf32>
    %68 = arith.mulf %65, %67 : vector<1x256xf32>
    %69 = arith.addf %64, %68 : vector<1x256xf32>
    %70 = vector.extract_strided_slice %1 {offsets = [3, 0], sizes = [1, 256], strides = [1, 1]} : vector<4x256xf32> to vector<1x256xf32>
    %c2_30 = arith.constant 2 : index
    %c3_31 = arith.constant 3 : index
    %71 = memref.load %arg2[%c2_30, %c3_31] : memref<6x4xf32, #tpu.memory_space<smem>>
    %72 = vector.broadcast %71 : f32 to vector<1x256xf32>
    %73 = arith.mulf %70, %72 : vector<1x256xf32>
    %74 = arith.addf %69, %73 : vector<1x256xf32>
    %c2_32 = arith.constant 2 : index
    %75 = memref.load %arg3[%c2_32] : memref<6xf32, #tpu.memory_space<smem>>
    %76 = vector.broadcast %75 : f32 to vector<1x256xf32>
    %77 = arith.addf %74, %76 : vector<1x256xf32>
    %cst_33 = arith.constant 0.000000e+00 : f32
    %78 = vector.broadcast %cst_33 : f32 to vector<1x256xf32>
    %79 = arith.maximumf %77, %78 : vector<1x256xf32>
    %c0_34 = arith.constant 0 : index
    %c2_35 = arith.constant 2 : index
    %c0_36 = arith.constant 0 : index
    %80 = vector.load %arg5[%c0_34, %c2_35, %c0_36] : memref<1x6x256xf32, #tpu.memory_space<vmem>>, vector<1x1x256xf32>
    %81 = vector.shape_cast %80 : vector<1x1x256xf32> to vector<1x256xf32>
    %82 = vector.shape_cast %79 : vector<1x256xf32> to vector<1x1x256xf32>
    tpu.vector_store %arg5[%c0_34, %c2_35, %c0_36], %82 {strides = array<i32>} : memref<1x6x256xf32, #tpu.memory_space<vmem>>, vector<1x1x256xf32>,
    %83 = vector.extract_strided_slice %1 {offsets = [0, 0], sizes = [1, 256], strides = [1, 1]} : vector<4x256xf32> to vector<1x256xf32>
    %c3_37 = arith.constant 3 : index
    %c0_38 = arith.constant 0 : index
    %84 = memref.load %arg2[%c3_37, %c0_38] : memref<6x4xf32, #tpu.memory_space<smem>>
    %85 = vector.broadcast %84 : f32 to vector<1x256xf32>
    %86 = arith.mulf %83, %85 : vector<1x256xf32>
    %87 = vector.extract_strided_slice %1 {offsets = [1, 0], sizes = [1, 256], strides = [1, 1]} : vector<4x256xf32> to vector<1x256xf32>
    %c3_39 = arith.constant 3 : index
    %c1_40 = arith.constant 1 : index
    %88 = memref.load %arg2[%c3_39, %c1_40] : memref<6x4xf32, #tpu.memory_space<smem>>
    %89 = vector.broadcast %88 : f32 to vector<1x256xf32>
    %90 = arith.mulf %87, %89 : vector<1x256xf32>
    %91 = arith.addf %86, %90 : vector<1x256xf32>
    %92 = vector.extract_strided_slice %1 {offsets = [2, 0], sizes = [1, 256], strides = [1, 1]} : vector<4x256xf32> to vector<1x256xf32>
    %c3_41 = arith.constant 3 : index
    %c2_42 = arith.constant 2 : index
    %93 = memref.load %arg2[%c3_41, %c2_42] : memref<6x4xf32, #tpu.memory_space<smem>>
    %94 = vector.broadcast %93 : f32 to vector<1x256xf32>
    %95 = arith.mulf %92, %94 : vector<1x256xf32>
    %96 = arith.addf %91, %95 : vector<1x256xf32>
    %97 = vector.extract_strided_slice %1 {offsets = [3, 0], sizes = [1, 256], strides = [1, 1]} : vector<4x256xf32> to vector<1x256xf32>
    %c3_43 = arith.constant 3 : index
    %c3_44 = arith.constant 3 : index
    %98 = memref.load %arg2[%c3_43, %c3_44] : memref<6x4xf32, #tpu.memory_space<smem>>
    %99 = vector.broadcast %98 : f32 to vector<1x256xf32>
    %100 = arith.mulf %97, %99 : vector<1x256xf32>
    %101 = arith.addf %96, %100 : vector<1x256xf32>
    %c3_45 = arith.constant 3 : index
    %102 = memref.load %arg3[%c3_45] : memref<6xf32, #tpu.memory_space<smem>>
    %103 = vector.broadcast %102 : f32 to vector<1x256xf32>
    %104 = arith.addf %101, %103 : vector<1x256xf32>
    %cst_46 = arith.constant 0.000000e+00 : f32
    %105 = vector.broadcast %cst_46 : f32 to vector<1x256xf32>
    %106 = arith.maximumf %104, %105 : vector<1x256xf32>
    %c0_47 = arith.constant 0 : index
    %c3_48 = arith.constant 3 : index
    %c0_49 = arith.constant 0 : index
    %107 = vector.load %arg5[%c0_47, %c3_48, %c0_49] : memref<1x6x256xf32, #tpu.memory_space<vmem>>, vector<1x1x256xf32>
    %108 = vector.shape_cast %107 : vector<1x1x256xf32> to vector<1x256xf32>
    %109 = vector.shape_cast %106 : vector<1x256xf32> to vector<1x1x256xf32>
    tpu.vector_store %arg5[%c0_47, %c3_48, %c0_49], %109 {strides = array<i32>} : memref<1x6x256xf32, #tpu.memory_space<vmem>>, vector<1x1x256xf32>,
    %110 = vector.extract_strided_slice %1 {offsets = [0, 0], sizes = [1, 256], strides = [1, 1]} : vector<4x256xf32> to vector<1x256xf32>
    %c4 = arith.constant 4 : index
    %c0_50 = arith.constant 0 : index
    %111 = memref.load %arg2[%c4, %c0_50] : memref<6x4xf32, #tpu.memory_space<smem>>
    %112 = vector.broadcast %111 : f32 to vector<1x256xf32>
    %113 = arith.mulf %110, %112 : vector<1x256xf32>
    %114 = vector.extract_strided_slice %1 {offsets = [1, 0], sizes = [1, 256], strides = [1, 1]} : vector<4x256xf32> to vector<1x256xf32>
    %c4_51 = arith.constant 4 : index
    %c1_52 = arith.constant 1 : index
    %115 = memref.load %arg2[%c4_51, %c1_52] : memref<6x4xf32, #tpu.memory_space<smem>>
    %116 = vector.broadcast %115 : f32 to vector<1x256xf32>
    %117 = arith.mulf %114, %116 : vector<1x256xf32>
    %118 = arith.addf %113, %117 : vector<1x256xf32>
    %119 = vector.extract_strided_slice %1 {offsets = [2, 0], sizes = [1, 256], strides = [1, 1]} : vector<4x256xf32> to vector<1x256xf32>
    %c4_53 = arith.constant 4 : index
    %c2_54 = arith.constant 2 : index
    %120 = memref.load %arg2[%c4_53, %c2_54] : memref<6x4xf32, #tpu.memory_space<smem>>
    %121 = vector.broadcast %120 : f32 to vector<1x256xf32>
    %122 = arith.mulf %119, %121 : vector<1x256xf32>
    %123 = arith.addf %118, %122 : vector<1x256xf32>
    %124 = vector.extract_strided_slice %1 {offsets = [3, 0], sizes = [1, 256], strides = [1, 1]} : vector<4x256xf32> to vector<1x256xf32>
    %c4_55 = arith.constant 4 : index
    %c3_56 = arith.constant 3 : index
    %125 = memref.load %arg2[%c4_55, %c3_56] : memref<6x4xf32, #tpu.memory_space<smem>>
    %126 = vector.broadcast %125 : f32 to vector<1x256xf32>
    %127 = arith.mulf %124, %126 : vector<1x256xf32>
    %128 = arith.addf %123, %127 : vector<1x256xf32>
    %c4_57 = arith.constant 4 : index
    %129 = memref.load %arg3[%c4_57] : memref<6xf32, #tpu.memory_space<smem>>
    %130 = vector.broadcast %129 : f32 to vector<1x256xf32>
    %131 = arith.addf %128, %130 : vector<1x256xf32>
    %cst_58 = arith.constant 0.000000e+00 : f32
    %132 = vector.broadcast %cst_58 : f32 to vector<1x256xf32>
    %133 = arith.maximumf %131, %132 : vector<1x256xf32>
    %c0_59 = arith.constant 0 : index
    %c4_60 = arith.constant 4 : index
    %c0_61 = arith.constant 0 : index
    %134 = vector.load %arg5[%c0_59, %c4_60, %c0_61] : memref<1x6x256xf32, #tpu.memory_space<vmem>>, vector<1x1x256xf32>
    %135 = vector.shape_cast %134 : vector<1x1x256xf32> to vector<1x256xf32>
    %136 = vector.shape_cast %133 : vector<1x256xf32> to vector<1x1x256xf32>
    tpu.vector_store %arg5[%c0_59, %c4_60, %c0_61], %136 {strides = array<i32>} : memref<1x6x256xf32, #tpu.memory_space<vmem>>, vector<1x1x256xf32>,
    %137 = vector.extract_strided_slice %1 {offsets = [0, 0], sizes = [1, 256], strides = [1, 1]} : vector<4x256xf32> to vector<1x256xf32>
    %c5 = arith.constant 5 : index
    %c0_62 = arith.constant 0 : index
    %138 = memref.load %arg2[%c5, %c0_62] : memref<6x4xf32, #tpu.memory_space<smem>>
    %139 = vector.broadcast %138 : f32 to vector<1x256xf32>
    %140 = arith.mulf %137, %139 : vector<1x256xf32>
    %141 = vector.extract_strided_slice %1 {offsets = [1, 0], sizes = [1, 256], strides = [1, 1]} : vector<4x256xf32> to vector<1x256xf32>
    %c5_63 = arith.constant 5 : index
    %c1_64 = arith.constant 1 : index
    %142 = memref.load %arg2[%c5_63, %c1_64] : memref<6x4xf32, #tpu.memory_space<smem>>
    %143 = vector.broadcast %142 : f32 to vector<1x256xf32>
    %144 = arith.mulf %141, %143 : vector<1x256xf32>
    %145 = arith.addf %140, %144 : vector<1x256xf32>
    %146 = vector.extract_strided_slice %1 {offsets = [2, 0], sizes = [1, 256], strides = [1, 1]} : vector<4x256xf32> to vector<1x256xf32>
    %c5_65 = arith.constant 5 : index
    %c2_66 = arith.constant 2 : index
    %147 = memref.load %arg2[%c5_65, %c2_66] : memref<6x4xf32, #tpu.memory_space<smem>>
    %148 = vector.broadcast %147 : f32 to vector<1x256xf32>
    %149 = arith.mulf %146, %148 : vector<1x256xf32>
    %150 = arith.addf %145, %149 : vector<1x256xf32>
    %151 = vector.extract_strided_slice %1 {offsets = [3, 0], sizes = [1, 256], strides = [1, 1]} : vector<4x256xf32> to vector<1x256xf32>
    %c5_67 = arith.constant 5 : index
    %c3_68 = arith.constant 3 : index
    %152 = memref.load %arg2[%c5_67, %c3_68] : memref<6x4xf32, #tpu.memory_space<smem>>
    %153 = vector.broadcast %152 : f32 to vector<1x256xf32>
    %154 = arith.mulf %151, %153 : vector<1x256xf32>
    %155 = arith.addf %150, %154 : vector<1x256xf32>
    %c5_69 = arith.constant 5 : index
    %156 = memref.load %arg3[%c5_69] : memref<6xf32, #tpu.memory_space<smem>>
    %157 = vector.broadcast %156 : f32 to vector<1x256xf32>
    %158 = arith.addf %155, %157 : vector<1x256xf32>
    %cst_70 = arith.constant 0.000000e+00 : f32
    %159 = vector.broadcast %cst_70 : f32 to vector<1x256xf32>
    %160 = arith.maximumf %158, %159 : vector<1x256xf32>
    %c0_71 = arith.constant 0 : index
    %c5_72 = arith.constant 5 : index
    %c0_73 = arith.constant 0 : index
    %161 = vector.load %arg5[%c0_71, %c5_72, %c0_73] : memref<1x6x256xf32, #tpu.memory_space<vmem>>, vector<1x1x256xf32>
    %162 = vector.shape_cast %161 : vector<1x1x256xf32> to vector<1x256xf32>
    %163 = vector.shape_cast %160 : vector<1x256xf32> to vector<1x1x256xf32>
    tpu.vector_store %arg5[%c0_71, %c5_72, %c0_73], %163 {strides = array<i32>} : memref<1x6x256xf32, #tpu.memory_space<vmem>>, vector<1x1x256xf32>,
    return
  }
  func.func @transform_0(%arg0: i32, %arg1: i32) -> (i32, i32) {
    %c0_i32 = arith.constant 0 : i32
    %c0_i32_0 = arith.constant 0 : i32
    %c0_i32_1 = arith.constant 0 : i32
    return %c0_i32, %c0_i32_0 : i32, i32
  }
  func.func @transform_1(%arg0: i32, %arg1: i32) -> i32 {
    %c0_i32 = arith.constant 0 : i32
    %c0_i32_0 = arith.constant 0 : i32
    return %c0_i32 : i32
  }
  func.func @transform_2(%arg0: i32, %arg1: i32) -> (i32, i32, i32) {
    %c0_i32 = arith.constant 0 : i32
    %c0_i32_0 = arith.constant 0 : i32
    return %arg0, %c0_i32, %arg1 : i32, i32, i32
  }
  func.func @transform_3(%arg0: i32, %arg1: i32) -> (i32, i32, i32) {
    %c0_i32 = arith.constant 0 : i32
    %c0_i32_0 = arith.constant 0 : i32
    return %arg0, %c0_i32, %arg1 : i32, i32, i32
  }
}

</mosaic_0001>

<bundles_post_ra>
// kernel: tpu_custom_call.1
= control target key start
LH: loop header
LB: loop body
LE: loop exit
PB: predicated region body
PF: predicated region fallthrough
CT: control target
= control target key end

     0   :  { %8 = vsyncpa [#allocation4], 0  ;;  %s1120_s0 = inlined_call_operand.vmem [shape: f32[6,4], index: 0, kind: input, shape index: {}]   ;;  %s1121_s1 = inlined_call_operand.vmem [shape: f32[6], index: 1, kind: input, shape index: {}]   ;;  %s1122_s2 = inlined_call_operand.hbm [shape: f32[2,4,256], index: 2, kind: input, shape index: {}]   ;;  %s1123_s3 = inlined_call_operand.vmem [shape: f32[2,6,256], index: 3, kind: output, shape index: {}]  }
   0x1   :  { %9 = vsyncpa [#allocation6], 0 }
   0x2   :  { %10 = vsyncpa [#allocation3], 0 }
   0x3   :  { %12 = vsyncpa [#allocation3 + $0x1], 0  ;;  %s884_s12 = smov 0   ;;  %s886_s13 = smov 0  }
   0x4   :  { %s888_s14 = smov 0   ;;  %s890_s15 = smov 0  }
   0x5   :  { %s892_s16 = smov 0   ;;  %s894_s17 = smov 0  }
   0x6 LB: > { %s596_s18 = sadd.s32 4294967295, %s860_s17   ;;  %p94_p0 = scmp.ne.s32.totalorder %s844_s13, %s840_s12  ;;  %s860_s17 = sphi %s894_s17, %s18_s17   ;;  %s856_s16 = sphi %s892_s16, %s1134_s16   ;;  %s852_s15 = sphi %s890_s15, %s1133_s15   ;;  %s848_s14 = sphi %s888_s14, %s1132_s14   ;;  %s844_s13 = sphi %s886_s13, %s1131_s13   ;;  %s840_s12 = sphi %s884_s12, %s1130_s12  }
   0x7   : > { %p914_p1 = scmp.eq.s32.totalorder %s596_s18, 0  ;;  %p598_p2 = scmp.ge.s32.totalorder %s860_s17, 1 }
   0x8   : > { %p133_p3 = scmp.lt.s32.totalorder %s860_s17, 3  ;;  %s145_s23 = sshll.u32 %s1120_s0, 4  ;;  %s146_s23 = int_to_ptr.vmem [resolvable:$true] %s145_s23 }
   0x9   : > { %p922_p4 = por %p914_p1, %p94_p0  ;;  %s155_s27 = sshll.u32 %s1121_s1, 4  ;;  %s156_s27 = int_to_ptr.vmem [resolvable:$true] %s155_s27 }
   0xa   : > { %p929_p5 = pnand %p598_p2, %p133_p3  ;;  %s862_s28 = smov [#allocation2]  }
   0xb   : > { %s863_s29 = smov [#allocation5]   ;;  %s30_s30 = sadd.s32 1, %s856_s16 }
   0xc   : > { %p676_p6 = pneg %p929_p5  ;;  %s81_s4 = sadd.s32 1, %s848_s14 }
   0xd   : > { %p32_p8 = scmp.ge.s32.totalorder %s30_s30, 2  ;;  %p88_p9 = scmp.ne.s32.totalorder %s848_s14, %s844_s13 }
   0xe   : > { %p677_p7 = pnand %p676_p6, %p914_p1  ;;  %p89_p10 = scmp.eq.s32.totalorder %s860_s17, 0 }
   0xf   : > { %p689_p11 = scmp.lt.s32.totalorder %s860_s17, 2  ;;  %s1136_s30 = smov (%p32_p8, %s30_s30), 0 }
  0x10   : > { %679 = dma.vmem_to_smem (!%p677_p7), %s146_s23, 128, %s862_s28, [#allocation4]  }
  0x11   : > { %682 = dma.vmem_to_smem (!%p677_p7), %s156_s27, 16, %s863_s29, [#allocation6]  }
  0x12   : > { %p948_p12 = por %p89_p10, %p88_p9  ;;  %s166_s6 = sand.u32 1, %s848_s14  }
  0x13   : > { %s76_s7 = ssub.s32 %s856_s16, %s1136_s30  ;;  %s602_s8 = sshll.u32 %s166_s6, 3 }
  0x14   : > { %p79_p13 = scmp.eq.s32.totalorder %s76_s7, 0  ;;  %s664_s9 = sshll.u32 %s856_s16, 3 }
  0x15   : > { %s177_s18 = scalar_lea.hbm %s1122_s2, %s664_s9  ;;  %s170_s21 = scalar_lea.vmem [#allocation7], %s602_s8 }
  0x16   : > { %s957_s10 = scalar_select %p79_p13, %s848_s14, %s81_s4  }
  0x17   : > { %s181_s22 = sshll.u32 %s170_s21, 4  ;;  %s179_s23 = sshll.u32 %s177_s18, 4  ;;  %s182_s22 = int_to_ptr.vmem [resolvable:$true] %s181_s22  ;;  %s180_s23 = int_to_ptr.hbm [resolvable:$true] %s179_s23 }
  0x18   : > { %p684_p0 = pnand %p689_p11, %p948_p12  ;;  %s167_s25 = scalar_lea.sflag [#allocation3], %s166_s6 }
  0x19   : > { %190 = sbr.rel (%p929_p5) target bundleno = 91 (0x5b), region = 32 }
  0x1a   : > { %686 = dma.hbm_to_vmem [thread:$0]  (!%p684_p0), %s180_s23, 128, %s182_s22, %s167_s25  }
  0x1e   : > { %827 = dma.done.wait (%p914_p1), [#allocation4], 128  }
  0x1f   : > { %829 = vsyncadd (%p914_p1), [#allocation4], 4294967168 }
  0x20   : > { %831 = dma.done.wait (%p914_p1), [#allocation6], 16  }
  0x21   : > { %833 = vsyncadd (%p914_p1), [#allocation6], 4294967280  ;;  %s202_s26 = sand.u32 1, %s844_s13  }
  0x22   : > { %s608_s27 = sshll.u32 %s202_s26, 3  ;;  %s203_s28 = scalar_lea.sflag [#allocation3], %s202_s26 }
  0x23   : > { %s206_s29 = scalar_lea.vmem [#allocation7], %s608_s27 }
  0x24   : > { %835 = dma.done.wait (%p922_p4), %s203_s28, 128  }
  0x25   : > { %837 = vsyncadd (%p922_p4), %s203_s28, 4294967168 }
  0x26   : > { %212 = sfence }
  0x27   : > { %p237_p2 = scmp.lt.s32.totalorder %s852_s15, 1  ;;  %s247_s24 = sld [smem:[#allocation2]]  ;;  %v985_v0 = vld [vmem:[%s206_s29] sm:$0xff]  ;;  %v283_v25 = vlaneseq  ;;  %vm280_vm0 = vcmask 1040384  }
  0x28   : > { %s611_s4 = sld [smem:[#allocation2 + $0x1]] }
  0x29   : > { %s1138_s15 = smov (!%p237_p2, %s852_s15), 1  ;;  %s613_s19 = sld [smem:[#allocation2 + $0x2]]  ;;  %vm1024_vm1 = vcmp.lt.s32.totalorder %v283_v25, 256 }
  0x2a   : > { %s615_s5 = sld [smem:[#allocation2 + $0x3]]  ;;  %s665_s28 = sshll.u32 %s1138_s15, 4 }
  0x2b   : > { %s987_s6 = sld [smem:[#allocation5]] }
  0x2c   : > { %s617_s7 = sld [smem:[#allocation2 + $0x80]] }
  0x2d   : > { %v248_v1 = vstv %s247_s24  ;;  %s618_s8 = sld [smem:[#allocation2 + $0x81]] }
  0x2e   : > { %v251_v2 = vstv %s611_s4  ;;  %v249_v3 = vmul.f32 %v248_v1, %v985_v0  ;;  %s620_s20 = sld [smem:[#allocation2 + $0x82]] }
  0x2f   : > { %v252_v4 = vmul.f32 %v251_v2, %v985_v0  ;;  %v259_v5 = vstv %s613_s19  ;;  %s622_s9 = sld [smem:[#allocation2 + $0x83]] }
  0x30   : > { %v260_v7 = vmul.f32 %v259_v5, %v985_v0  ;;  %v267_v8 = vstv %s615_s5  ;;  %s992_s11 = sld [smem:[#allocation5 + $0x1]]  ;;  %s1035_s5 = scalar_lea.vmem %s1123_s3, %s665_s28 }
  0x31   : > { %v612_v6 = vrot.slane %v252_v4, 9  ;;  %v268_v9 = vmul.f32 %v267_v8, %v985_v0  ;;  %s995_s12 = sld [smem:[#allocation2 + $0x100]]  ;;  %v275_v19 = vstv %s987_s6 }
  0x32   : > { %v614_v11 = vrot.slane %v260_v7, 10  ;;  %v290_v12 = vstv %s617_s7  ;;  %s997_s18 = sld [smem:[#allocation2 + $0x101]] }
  0x33   : > { %v257_v10 = vadd.f32 %v612_v6, %v249_v3  ;;  %v616_v13 = vrot.slane %v268_v9, 11  ;;  %v293_v14 = vstv %s618_s8  ;;  %s629_s21 = sld [smem:[#allocation2 + $0x102]]  ;;  %v291_v16 = vmul.f32 %v290_v12, %v985_v0 }
  0x34   : > { %v294_v17 = vmul.f32 %v293_v14, %v985_v0  ;;  %v301_v18 = vstv %s620_s20  ;;  %s1001_s22 = sld [smem:[#allocation2 + $0x103]] }
  0x35   : > { %v265_v15 = vadd.f32 %v614_v11, %v257_v10  ;;  %v302_v20 = vmul.f32 %v301_v18, %v985_v0  ;;  %v309_v21 = vstv %s622_s9  ;;  %s1005_s23 = sld [smem:[#allocation5 + $0x2]] }
  0x36   : > { %v619_v23 = vrot.slane %v294_v17, 9  ;;  %v310_v24 = vmul.f32 %v309_v21, %v985_v0  ;;  %s1008_s25 = sld [smem:[#allocation2 + $0x180]]  ;;  %v317_v39 = vstv %s992_s11 }
  0x37   : > { %v273_v22 = vadd.f32 %v616_v13, %v265_v15  ;;  %v621_v26 = vrot.slane %v302_v20, 10  ;;  %v328_v27 = vstv %s995_s12  ;;  %s1011_s26 = sld [smem:[#allocation2 + $0x181]] }
  0x38   : > { %v299_v29 = vadd.f32 %v619_v23, %v291_v16  ;;  %v623_v30 = vrot.slane %v310_v24, 11  ;;  %s1013_s27 = sld [smem:[#allocation2 + $0x182]]  ;;  %v329_v31 = vmul.f32 %v328_v27, %v985_v0  ;;  %v331_v32 = vstv %s997_s18 }
  0x39   : > { %v276_v28 = vadd.f32 %v275_v19, %v273_v22  ;;  %v339_v33 = vstv %s629_s21  ;;  %s1018_s29 = sld [smem:[#allocation2 + $0x183]]  ;;  %v332_v36 = vmul.f32 %v331_v32, %v985_v0 }
  0x3a   : > { %v307_v35 = vadd.f32 %v621_v26, %v299_v29  ;;  %v340_v37 = vmul.f32 %v339_v33, %v985_v0  ;;  %s1022_s24 = sld [smem:[#allocation5 + $0x3]]  ;;  %v347_v40 = vstv %s1001_s22 }
  0x3b   : > { %v277_v34 = vmax.f32 %v276_v28, 0.0  ;;  %s1030_s15 = sld [smem:[#allocation2 + $0x200]]  ;;  %v628_v43 = vrot.slane %v332_v36, 9  ;;  %v348_v45 = vmul.f32 %v347_v40, %v985_v0  ;;  %v355_v60 = vstv %s1005_s23 }
  0x3c   : > { %v315_v42 = vadd.f32 %v623_v30, %v307_v35  ;;  %v630_v44 = vrot.slane %v340_v37, 10  ;;  %s1037_s6 = sld [smem:[#allocation2 + $0x201]]  ;;  %v366_v46 = vstv %s1008_s25 }
  0x3d   : > { %v279_v41 = vrot.slane %v277_v34, 3  ;;  %v369_v47 = vstv %s1011_s26  ;;  %s1042_s7 = sld [smem:[#allocation2 + $0x202]]  ;;  %v337_v50 = vadd.f32 %v628_v43, %v329_v31  ;;  %v367_v51 = vmul.f32 %v366_v46, %v985_v0 }
  0x3e   : > { %v318_v49 = vadd.f32 %v317_v39, %v315_v42  ;;  %s1046_s8 = sld [smem:[#allocation2 + $0x203]]  ;;  %v632_v52 = vrot.slane %v348_v45, 11  ;;  %v370_v53 = vmul.f32 %v369_v47, %v985_v0  ;;  %v377_v54 = vstv %s1013_s27 }
  0x3f   : > { %v281_v48 = vsel %vm280_vm0, %v277_v34, %v279_v41  ;;  %v385_v55 = vstv %s1018_s29  ;;  %s1054_s20 = sld [smem:[#allocation5 + $0x4]]  ;;  %v345_v57 = vadd.f32 %v630_v44, %v337_v50  ;;  %v378_v58 = vmul.f32 %v377_v54, %v985_v0 }
  0x40   : > { %287 = vst.msk [vmem:[%s1035_s5] ss:$8 sm:$0x3] %vm1024_vm1, %v281_v48  ;;  %v319_v56 = vmax.f32 %v318_v49, 0.0  ;;  %v386_v59 = vmul.f32 %v385_v55, %v985_v0  ;;  %s1058_s9 = sld [smem:[#allocation2 + $0x280]]  ;;  %v637_v61 = vrot.slane %v370_v53, 9  ;;  %v393_v13 = vstv %s1022_s24 }
  0x41   : > { %v404_v62 = vstv %s1030_s15  ;;  %s1062_s11 = sld [smem:[#allocation2 + $0x281]]  ;;  %v353_v1 = vadd.f32 %v632_v52, %v345_v57  ;;  %v639_v2 = vrot.slane %v378_v58, 10 }
  0x42   : > { %v321_v63 = vrot.slane %v319_v56, 3  ;;  %v641_v3 = vrot.slane %v386_v59, 11  ;;  %s1064_s12 = sld [smem:[#allocation2 + $0x282]]  ;;  %v375_v4 = vadd.f32 %v637_v61, %v367_v51  ;;  %v405_v5 = vmul.f32 %v404_v62, %v985_v0 }
  0x43   : > { %v407_v6 = vstv %s1037_s6  ;;  %v415_v7 = vstv %s1042_s7  ;;  %s658_s18 = sld [smem:[#allocation2 + $0x283]]  ;;  %v356_v9 = vadd.f32 %v355_v60, %v353_v1 }
  0x44   : > { %v322_v8 = vsel %vm280_vm0, %v319_v56, %v321_v63  ;;  %v408_v10 = vmul.f32 %v407_v6, %v985_v0  ;;  %v416_v11 = vmul.f32 %v415_v7, %v985_v0  ;;  %v383_v12 = vadd.f32 %v639_v2, %v375_v4  ;;  %s660_s21 = sld [smem:[#allocation5 + $0x5]] }
  0x45   : > { %625 = vst.msk [vmem:[%s1035_s5 + $0x1] ss:$8 sm:$0x3] %vm1024_vm1, %v322_v8  ;;  %v423_v14 = vstv %s1046_s8  ;;  %v357_v15 = vmax.f32 %v356_v9, 0.0  ;;  %v431_v35 = vstv %s1054_s20 }
  0x46   : > { %v646_v16 = vrot.slane %v408_v10, 9  ;;  %v648_v17 = vrot.slane %v416_v11, 10  ;;  %v424_v18 = vmul.f32 %v423_v14, %v985_v0  ;;  %v391_v19 = vadd.f32 %v641_v3, %v383_v12 }
  0x47   : > { %v442_v20 = vstv %s1058_s9  ;;  %v445_v21 = vstv %s1062_s11  ;;  %v359_v22 = vrot.slane %v357_v15, 3 }
  0x48   : > { %v413_v23 = vadd.f32 %v646_v16, %v405_v5  ;;  %v650_v24 = vrot.slane %v424_v18, 11  ;;  %v443_v25 = vmul.f32 %v442_v20, %v985_v0  ;;  %v394_v26 = vadd.f32 %v393_v13, %v391_v19 }
  0x49   : > { %v446_v27 = vmul.f32 %v445_v21, %v985_v0  ;;  %v453_v28 = vstv %s1064_s12  ;;  %v461_v29 = vstv %s658_s18  ;;  %v360_v30 = vsel %vm280_vm0, %v357_v15, %v359_v22 }
  0x4a   : > { %v421_v31 = vadd.f32 %v648_v17, %v413_v23  ;;  %v454_v32 = vmul.f32 %v453_v28, %v985_v0  ;;  %v462_v33 = vmul.f32 %v461_v29, %v985_v0  ;;  %634 = vst.msk [vmem:[%s1035_s5 + $0x2] ss:$8 sm:$0x3] %vm1024_vm1, %v360_v30  ;;  %v395_v34 = vmax.f32 %v394_v26, 0.0 }
  0x4b   : > { %v655_v36 = vrot.slane %v446_v27, 9  ;;  %v469_v46 = vstv %s660_s21 }
  0x4c   : > { %v429_v37 = vadd.f32 %v650_v24, %v421_v31  ;;  %v657_v39 = vrot.slane %v454_v32, 10  ;;  %v397_v40 = vrot.slane %v395_v34, 3  ;;  %v659_v42 = vrot.slane %v462_v33, 11 }
  0x4d   : > { %v451_v41 = vadd.f32 %v655_v36, %v443_v25 }
  0x4e   : > { %v432_v43 = vadd.f32 %v431_v35, %v429_v37  ;;  %v398_v44 = vsel %vm280_vm0, %v395_v34, %v397_v40 }
  0x4f   : > { %v459_v45 = vadd.f32 %v657_v39, %v451_v41  ;;  %643 = vst.msk [vmem:[%s1035_s5 + $0x3] ss:$8 sm:$0x3] %vm1024_vm1, %v398_v44 }
  0x50   : > { %v433_v0 = vmax.f32 %v432_v43, 0.0 }
  0x51   : > { %v467_v47 = vadd.f32 %v659_v42, %v459_v45 }
  0x52   : > { %v435_v48 = vrot.slane %v433_v0, 3 }
  0x53   : > { %v470_v49 = vadd.f32 %v469_v46, %v467_v47 }
  0x54   : > { %v436_v50 = vsel %vm280_vm0, %v433_v0, %v435_v48 }
  0x55   : > { %652 = vst.msk [vmem:[%s1035_s5 + $0x4] ss:$8 sm:$0x3] %vm1024_vm1, %v436_v50  ;;  %v471_v51 = vmax.f32 %v470_v49, 0.0 }
  0x57   : > { %v473_v52 = vrot.slane %v471_v51, 3 }
  0x59   : > { %v474_v53 = vsel %vm280_vm0, %v471_v51, %v473_v52 }
  0x5a   : > { %661 = vst.msk [vmem:[%s1035_s5 + $0x5] ss:$8 sm:$0x3] %vm1024_vm1, %v474_v53 }
  0x5b PF: > { %s18_s17 = sadd.s32 1, %s860_s17   ;;  %s1130_s12 = smov %s844_s13 }
  0x5c   : > { %p15_p1 = scmp.ge.s32.totalorder %s18_s17, 4   ;;  %s1131_s13 = smov %s848_s14 }
  0x5d   : > { %s1132_s14 = smov %s957_s10  ;;  %s1133_s15 = smov %s856_s16 }
  0x5e   : > { %s1134_s16 = smov %s1136_s30  ;;  %17 = sbr.rel (!%p15_p1) target bundleno = 6 (0x6), region = 86 }
  0x63   :  { %509 = vsyncpa [#allocation3], 1 }
  0x64   :  { %511 = vsyncpa [#allocation3 + $0x1], 1 }
  0x65   :  { %512 = vsyncpa [#allocation4], 1 }
  0x66   :  { %514 = vsyncpa [#allocation4 + $0x1], 1 }
  0x67   :  { %515 = vsyncpa [#allocation6], 1 }

</bundles_post_ra>
